<compile_context>
chip_gen: v6e
topology: v6e:2x2x1
jax: 0.10.0
libtpu: 0.0.40
codegen_flags: <defaults>
</compile_context>

<pallas_src>
import jax
import jax.numpy as jnp
from jax.experimental import pallas as pl
from jax.experimental.pallas import tpu as pltpu


# ---------------------------------------------------------------------------
# Kernels
# ---------------------------------------------------------------------------

def _onehot_gather_kernel(ids_ref, w_ref, out_ref):
    """Block-wide gather via one-hot matmul (small vocabularies).

    ids_ref : (t_blk, 1) int32 block of token ids (VMEM).
    w_ref   : (vocab_pad, emb_dim) full table, VMEM resident (constant block).
    out_ref : (t_blk, emb_dim) output tile.
    """
    t_blk = out_ref.shape[0]
    vocab_pad = w_ref.shape[0]
    ids = ids_ref[...]                                             # (t_blk, 1)
    iota = jax.lax.broadcasted_iota(jnp.int32, (t_blk, vocab_pad), 1)
    one_hot = (iota == ids).astype(w_ref.dtype)                    # (t_blk, vocab_pad)
    out_ref[...] = jnp.dot(
        one_hot, w_ref[...], preferred_element_type=jnp.float32
    ).astype(out_ref.dtype)


def _rowgather_kernel(ids_ref, w_ref, out_ref):
    """Fallback row gather for large vocabularies (ids scalar-prefetched in SMEM).

    ids_ref : SMEM ref holding all padded flattened ids (scalar prefetch).
    w_ref   : (emb_num, emb_dim) full table, VMEM resident.
    out_ref : (t_blk, emb_dim) output tile.
    """
    t_blk = out_ref.shape[0]
    base = pl.program_id(0) * t_blk

    def body(t, carry):
        idx = ids_ref[base + t]
        out_ref[pl.ds(t, 1), :] = w_ref[pl.ds(idx, 1), :]
        return carry

    # fori_loop keeps code size / live ranges bounded; small unroll for LLO.
    jax.lax.fori_loop(0, t_blk, body, 0, unroll=8)


# ---------------------------------------------------------------------------
# Wrapper
# ---------------------------------------------------------------------------

def _round_up(x: int, m: int) -> int:
    return (x + m - 1) // m * m


# Packed sublane count per itemsize (f32 -> 8, bf16 -> 16, int8 -> 32).
_SUBLANE_PACK = {4: 8, 2: 16, 1: 32}


def _vmem_capacity_bytes() -> int:
    try:
        return int(pltpu.get_tpu_info().vmem_capacity_bytes)
    except Exception:
        return 64 * 1024 * 1024  # conservative: v7x per-TensorCore VMEM


def embedding_lookup(ids: jax.Array, weight: jax.Array, *,
                     tokens_per_block: int = 256,
                     onehot_vocab_limit: int = 2048) -> jax.Array:
    """Gather rows of `weight` indexed by integer `ids` (nn.Embedding forward)."""
    emb_num, emb_dim = weight.shape
    itemsize = jnp.dtype(weight.dtype).itemsize
    pack = _SUBLANE_PACK.get(itemsize, 8)

    # VMEM accesses are unchecked on TPU; clamp untrusted ids (PyTorch would
    # raise on out-of-range ids — documented behavioral difference).
    flat_ids = jnp.clip(ids.reshape(-1).astype(jnp.int32), 0, emb_num - 1)
    n_tokens = flat_ids.shape[0]

    # Dtype-aware, large token blocks (amortize per-step overhead, dense stores).
    t_blk = min(_round_up(tokens_per_block, pack), _round_up(n_tokens, pack))
    n_blocks = pl.cdiv(n_tokens, t_blk)
    n_padded = n_blocks * t_blk
    if n_padded != n_tokens:
        flat_ids = jnp.pad(flat_ids, (0, n_padded - n_tokens))

    vmem_capacity = _vmem_capacity_bytes()
    out_block_bytes = t_blk * emb_dim * itemsize

    if emb_num <= onehot_vocab_limit:
        # ---- Hot path: one-hot MXU gather, vectorized across the whole block.
        vocab_pad = _round_up(emb_num, 256)  # MXU-friendly on all generations
        w = weight
        if vocab_pad != emb_num:
            w = jnp.pad(weight, ((0, vocab_pad - emb_num), (0, 0)))
        table_bytes = vocab_pad * emb_dim * itemsize

        single_buffer_table = table_bytes > (4 << 20)
        table_buffers = 1 if single_buffer_table else 2
        id_block_bytes = t_blk * 4
        need = (table_buffers * table_bytes
                + 2 * out_block_bytes
                + 2 * id_block_bytes
                + t_blk * vocab_pad * 4      # one-hot intermediate headroom
                + (2 << 20))
        if need > vmem_capacity:
            # TODO(synk): stream table tiles / DMA-gather rows for tables that
            # do not fit VMEM on this generation.
            raise NotImplementedError("embedding table too large for VMEM-resident gather")
        vmem_limit = int(min(max(need, 32 << 20), vmem_capacity))

        table_spec_kwargs = {}
        if single_buffer_table:
            # Constant block: one buffer is enough, reclaim a full table of VMEM.
            table_spec_kwargs["pipeline_mode"] = pl.Buffered(1)
        table_spec = pl.BlockSpec((vocab_pad, emb_dim), lambda i: (0, 0),
                                  **table_spec_kwargs)

        ids_2d = flat_ids.reshape(n_padded, 1)
        out_flat = pl.pallas_call(
            _onehot_gather_kernel,
            out_shape=jax.ShapeDtypeStruct((n_padded, emb_dim), weight.dtype),
            grid=(n_blocks,),
            in_specs=[
                pl.BlockSpec((t_blk, 1), lambda i: (i, 0)),   # per-block ids (VMEM)
                table_spec,                                   # full table, resident
            ],
            out_specs=pl.BlockSpec((t_blk, emb_dim), lambda i: (i, 0)),
            compiler_params=pltpu.CompilerParams(
                dimension_semantics=("parallel",),
                vmem_limit_bytes=vmem_limit,
            ),
        )(ids_2d, w)

    else:
        # ---- Fallback: large vocabulary (still VMEM resident): fori_loop row
        # gather driven by scalar-prefetched ids, single-buffered table.
        table_bytes = emb_num * emb_dim * itemsize
        single_buffer_table = table_bytes > (4 << 20)
        table_buffers = 1 if single_buffer_table else 2
        need = table_buffers * table_bytes + 2 * out_block_bytes + (2 << 20)
        if need > int(0.9 * vmem_capacity):
            # TODO(synk): tile the vocab axis / manual gather DMAs for tables too
            # large to be VMEM-resident on this generation.
            raise NotImplementedError("embedding table too large for VMEM-resident gather")
        vmem_limit = int(min(max(need + (8 << 20), 32 << 20), vmem_capacity))
        # NOTE: scalar-prefetched ids pad to next_pow2(4N) bytes in SMEM; fine
        # for typical batch*seq, revisit for very large token counts.

        table_spec_kwargs = {}
        if single_buffer_table:
            table_spec_kwargs["pipeline_mode"] = pl.Buffered(1)

        grid_spec = pltpu.PrefetchScalarGridSpec(
            num_scalar_prefetch=1,
            grid=(n_blocks,),
            in_specs=[
                pl.BlockSpec((emb_num, emb_dim), lambda i, ids_p: (0, 0),
                             **table_spec_kwargs),
            ],
            out_specs=pl.BlockSpec((t_blk, emb_dim), lambda i, ids_p: (i, 0)),
        )
        out_flat = pl.pallas_call(
            _rowgather_kernel,
            out_shape=jax.ShapeDtypeStruct((n_padded, emb_dim), weight.dtype),
            grid_spec=grid_spec,
            compiler_params=pltpu.CompilerParams(
                dimension_semantics=("parallel",),
                vmem_limit_bytes=vmem_limit,
            ),
        )(flat_ids, weight)

    return out_flat[:n_tokens].reshape(ids.shape + (emb_dim,))


# ---------------------------------------------------------------------------
# Demo / correctness check
# ---------------------------------------------------------------------------

if __name__ == "__main__":
    # Small deterministic configuration consistent with the module:
    # emb_num = 32 vocabulary entries, emb_dim = 128, inputs of shape (2, 8).
    emb_num = 32
    emb_dim = 128
    batch, seq = 2, 8

    key = jax.random.PRNGKey(0)
    k_w, k_ids = jax.random.split(key)

    # Deterministic table; zero row 0 to mirror nn.Embedding(padding_idx=0).
    weight = jax.random.normal(k_w, (emb_num, emb_dim), dtype=jnp.float32)
    weight = weight.at[0].set(0.0)

    ids = jax.random.randint(k_ids, (batch, seq), minval=0, maxval=emb_num,
                             dtype=jnp.int32)
    ids = ids.at[0, 0].set(0)  # ensure padding_idx appears

    out = embedding_lookup(ids, weight)
    out = jax.block_until_ready(out)

    # Reference: plain JAX gather (same semantics as the nn.Embedding forward).
    ref = weight[ids]
    assert out.shape == (batch, seq, emb_dim)
    assert out.dtype == weight.dtype
    assert jnp.allclose(out, ref), "mismatch vs reference gather"
    assert jnp.all(out[0, 0] == 0.0), "padding row should be zeros"

    print("KERNEL_OK")
</pallas_src>

<mosaic_0001>
module attributes {stable_mosaic.version = 11 : i64} {
  func.func @_onehot_gather_kernel(%arg0: i32, %arg1: memref<16x1xi32, #tpu.memory_space<vmem>>, %arg2: memref<256x128xf32, #tpu.memory_space<vmem>>, %arg3: memref<16x128xf32, #tpu.memory_space<vmem>>) attributes {dimension_semantics = [#tpu.dimension_semantics<parallel>], iteration_bounds = array<i64: 1>, scalar_prefetch = 0 : i64, scratch_operands = 0 : i64, tpu.core_type = #tpu.core_type<tc>, window_params = [{transform_indices = @transform_0, window_bounds = array<i64: 16, 1>}, {pipeline_mode = #tpu.pipeline_mode<synchronous>, transform_indices = @transform_1, window_bounds = array<i64: 256, 128>}, {transform_indices = @transform_2, window_bounds = array<i64: 16, 128>}]} {
    %c0 = arith.constant 0 : index
    %c0_0 = arith.constant 0 : index
    %0 = vector.load %arg1[%c0, %c0_0] : memref<16x1xi32, #tpu.memory_space<vmem>>, vector<16x1xi32>
    %1 = tpu.iota {dimensions = array<i32: 1>} : vector<16x256xi32>
    %2 = vector.broadcast %0 : vector<16x1xi32> to vector<16x256xi32>
    %3 = arith.cmpi eq, %1, %2 : vector<16x256xi32>
    %4 = arith.extui %3 : vector<16x256xi1> to vector<16x256xi32>
    %5 = arith.sitofp %4 : vector<16x256xi32> to vector<16x256xf32>
    %c0_1 = arith.constant 0 : index
    %c0_2 = arith.constant 0 : index
    %6 = vector.load %arg2[%c0_1, %c0_2] : memref<256x128xf32, #tpu.memory_space<vmem>>, vector<256x128xf32>
    %cst = arith.constant dense<0.000000e+00> : vector<16x128xf32>
    %7 = tpu.matmul %5, %6, %cst {dimension_numbers = #tpu.dot_dimension_numbers<[1], [0], [0], [1], [0, 0, 1, 1], [], []>} : vector<16x256xf32>, vector<256x128xf32>, vector<16x128xf32> -> vector<16x128xf32>
    %c0_3 = arith.constant 0 : index
    %c0_4 = arith.constant 0 : index
    %8 = vector.load %arg3[%c0_3, %c0_4] : memref<16x128xf32, #tpu.memory_space<vmem>>, vector<16x128xf32>
    tpu.vector_store %arg3[%c0_3, %c0_4], %7 {strides = array<i32>} : memref<16x128xf32, #tpu.memory_space<vmem>>, vector<16x128xf32>,
    return
  }
  func.func @transform_0(%arg0: i32) -> (i32, i32) {
    %c0_i32 = arith.constant 0 : i32
    %c0_i32_0 = arith.constant 0 : i32
    return %arg0, %c0_i32 : i32, i32
  }
  func.func @transform_1(%arg0: i32) -> (i32, i32) {
    %c0_i32 = arith.constant 0 : i32
    %c0_i32_0 = arith.constant 0 : i32
    %c0_i32_1 = arith.constant 0 : i32
    return %c0_i32, %c0_i32_0 : i32, i32
  }
  func.func @transform_2(%arg0: i32) -> (i32, i32) {
    %c0_i32 = arith.constant 0 : i32
    %c0_i32_0 = arith.constant 0 : i32
    return %arg0, %c0_i32 : i32, i32
  }
}

</mosaic_0001>

<bundles_post_ra>
// kernel: tpu_custom_call.1
= control target key start
LH: loop header
LB: loop body
LE: loop exit
PB: predicated region body
PF: predicated region fallthrough
CT: control target
= control target key end

     0   :  { %7 = vsyncpa [#allocation3], 0  ;;  %s343_s0 = inlined_call_operand.vmem [shape: s32[16,1], index: 0, kind: input, shape index: {}]   ;;  %s344_s1 = inlined_call_operand.hbm [shape: f32[256,128], index: 1, kind: input, shape index: {}]   ;;  %s345_s2 = inlined_call_operand.hbm [shape: f32[16,128], index: 2, kind: output, shape index: {}]  }
   0x1   :  { %8 = vsyncpa [#allocation4], 0  ;;  %s304_s9 = smov [#allocation2]  }
   0x2   :  { %s16_s10 = sshll.u32 %s304_s9, 4  ;;  %s17_s10 = int_to_ptr.vmem [resolvable:$true] %s16_s10 }
   0x3   :  { %s268_s11 = scalar_lea.vmem %s17_s10, 4096  ;;  %p273_p1 = scmp.lt.s32.totalorder %s17_s10, %s17_s10 }
   0x4   :  { %p269_p0 = scmp.ne.s32.totalorder %s17_s10, %s268_s11  ;;  %p274_p2 = scmp.lt.s32.totalorder %s268_s11, %s268_s11 }
   0x6   :  { %p275_p3 = por %p274_p2, %p273_p1 }
   0x8   :  { %p276_p4 = pnand %p275_p3, %p269_p0 }
   0xa   :  { %279 = shalt.err (!%p276_p4)
}
   0xb   :  { %s305_s12 = smov 128   ;;  %s306_s13 = smov 8  }
   0xc   :  { %22 = dma.hbm_to_vmem [thread:$0]  %s344_s1, 4096, %s17_s10, [#allocation3], %s305_s12, %s305_s12, %s306_s13  }
   0xd   :  { %300 = dma.done.wait [#allocation3], 4096  }
   0xe   :  { %301 = vsyncadd [#allocation3], 4294963200  ;;  %v307_v0 = vmov 0   ;;  %v26_v1 = vld [vmem:[%s343_s0] sm:$0xff]  ;;  %v80_v2 = vld [vmem:[#allocation2 + $0xf8] sm:$0xff]  ;;  %v28_v35 = vlaneseq  ;;  %v308_v39 = vmov 1.0  }
   0xf   :  { %259 = vset.pattern.permute.xlu0 %v307_v0  ;;  %183 = vmatprep.subr.mxu0 %v80_v2  ;;  %v64_v3 = vld [vmem:[#allocation2 + $0x78] sm:$0xff]  ;;  %v79_v4 = vld [vmem:[#allocation2 + $0xf0] sm:$0xff]  ;;  %v27_v6 = vld [vmem:[%s343_s0 + $0x8] sm:$0xff]  ;;  %s309_s0 = smov [#allocation5]  }
  0x10   :  { %32 = vperm.xlu0 %259, %v26_v1   ;;  %v63_v5 = vld [vmem:[#allocation2 + $0x70] sm:$0xff]  ;;  %184 = vmatpush3.msra.mxu0 %v64_v3  ;;  %v78_v7 = vld [vmem:[#allocation2 + $0xe8] sm:$0xff]  ;;  %v77_v9 = vld [vmem:[#allocation2 + $0xe0] sm:$0xff]  ;;  %v29_v36 = vand.u32 127, %v28_v35  ;;  %s163_s1 = sshll.u32 %s309_s0, 4  ;;  %s164_s1 = int_to_ptr.vmem [resolvable:$true] %s163_s1 }
  0x11   :  { %221 = vmatprep.subr.mxu1 %v80_v2  ;;  %185 = vmatprep.subr.mxu0 %v79_v4  ;;  %v62_v8 = vld [vmem:[#allocation2 + $0x68] sm:$0xff]  ;;  %v61_v10 = vld [vmem:[#allocation2 + $0x60] sm:$0xff]  ;;  %v76_v11 = vld [vmem:[#allocation2 + $0xd8] sm:$0xff]  ;;  %s280_s20 = scalar_lea.vmem %s164_s1, 256  ;;  %p285_p6 = scmp.lt.s32.totalorder %s164_s1, %s164_s1 }
  0x12   :  { %237 = vmatpush3.msra.mxu1 %v64_v3  ;;  %186 = vmatpush3.msra.mxu0 %v63_v5  ;;  %v60_v12 = vld [vmem:[#allocation2 + $0x58] sm:$0xff]  ;;  %v75_v13 = vld [vmem:[#allocation2 + $0xd0] sm:$0xff]  ;;  %v74_v15 = vld [vmem:[#allocation2 + $0xc8] sm:$0xff]  ;;  %v30_v37 = vadd.s32 128, %v29_v36  ;;  %p281_p5 = scmp.ne.s32.totalorder %s164_s1, %s280_s20  ;;  %p286_p7 = scmp.lt.s32.totalorder %s280_s20, %s280_s20 }
  0x13   :  { %222 = vmatprep.subr.mxu1 %v79_v4  ;;  %187 = vmatprep.subr.mxu0 %v78_v7  ;;  %v59_v14 = vld [vmem:[#allocation2 + $0x50] sm:$0xff]  ;;  %v58_v16 = vld [vmem:[#allocation2 + $0x48] sm:$0xff]  ;;  %v73_v17 = vld [vmem:[#allocation2 + $0xc0] sm:$0xff] }
  0x14   :  { %35 = vperm.xlu0 %259, %v27_v6   ;;  %188 = vmatpush3.msra.mxu0 %v62_v8  ;;  %v57_v18 = vld [vmem:[#allocation2 + $0x40] sm:$0xff]  ;;  %v72_v19 = vld [vmem:[#allocation2 + $0xb8] sm:$0xff]  ;;  %v71_v21 = vld [vmem:[#allocation2 + $0xb0] sm:$0xff]  ;;  %p287_p8 = por %p286_p7, %p285_p6 }
  0x15   :  { %238 = vmatpush3.msra.mxu1 %v63_v5  ;;  %189 = vmatprep.subr.mxu0 %v77_v9  ;;  %v56_v20 = vld [vmem:[#allocation2 + $0x38] sm:$0xff]  ;;  %v55_v22 = vld [vmem:[#allocation2 + $0x30] sm:$0xff]  ;;  %v70_v23 = vld [vmem:[#allocation2 + $0xa8] sm:$0xff] }
  0x16   :  { %223 = vmatprep.subr.mxu1 %v78_v7  ;;  %190 = vmatpush3.msra.mxu0 %v61_v10  ;;  %v54_v24 = vld [vmem:[#allocation2 + $0x28] sm:$0xff]  ;;  %v69_v25 = vld [vmem:[#allocation2 + $0xa0] sm:$0xff]  ;;  %v68_v27 = vld [vmem:[#allocation2 + $0x98] sm:$0xff]  ;;  %p288_p9 = pnand %p287_p8, %p281_p5 }
  0x17   :  { %239 = vmatpush3.msra.mxu1 %v62_v8  ;;  %191 = vmatprep.subr.mxu0 %v76_v11  ;;  %v53_v26 = vld [vmem:[#allocation2 + $0x20] sm:$0xff]  ;;  %v52_v28 = vld [vmem:[#allocation2 + $0x18] sm:$0xff]  ;;  %v67_v29 = vld [vmem:[#allocation2 + $0x90] sm:$0xff] }
  0x18   :  { %224 = vmatprep.subr.mxu1 %v77_v9  ;;  %192 = vmatpush3.msra.mxu0 %v60_v12  ;;  %v51_v30 = vld [vmem:[#allocation2 + $0x10] sm:$0xff]  ;;  %v66_v31 = vld [vmem:[#allocation2 + $0x88] sm:$0xff]  ;;  %v65_v33 = vld [vmem:[#allocation2 + $0x80] sm:$0xff] }
  0x19   :  { %240 = vmatpush3.msra.mxu1 %v61_v10  ;;  %193 = vmatprep.subr.mxu0 %v75_v13  ;;  %v50_v32 = vld [vmem:[#allocation2 + $0x8] sm:$0xff]  ;;  %v49_v34 = vld [vmem:[#allocation2] sm:$0xff] }
  0x1a   :  { %225 = vmatprep.subr.mxu1 %v76_v11  ;;  %194 = vmatpush3.msra.mxu0 %v59_v14 }
  0x1b   :  { %241 = vmatpush3.msra.mxu1 %v60_v12  ;;  %195 = vmatprep.subr.mxu0 %v74_v15 }
  0x1c   :  { %226 = vmatprep.subr.mxu1 %v75_v13  ;;  %196 = vmatpush3.msra.mxu0 %v58_v16 }
  0x1d   :  { %242 = vmatpush3.msra.mxu1 %v59_v14  ;;  %197 = vmatprep.subr.mxu0 %v73_v17 }
  0x1e   :  { %227 = vmatprep.subr.mxu1 %v74_v15  ;;  %198 = vmatpush3.msra.mxu0 %v57_v18 }
  0x1f   :  { %243 = vmatpush3.msra.mxu1 %v58_v16  ;;  %199 = vmatprep.subr.mxu0 %v72_v19 }
  0x20   :  { %228 = vmatprep.subr.mxu1 %v73_v17  ;;  %200 = vmatpush3.msra.mxu0 %v56_v20 }
  0x21   :  { %244 = vmatpush3.msra.mxu1 %v57_v18  ;;  %201 = vmatprep.subr.mxu0 %v71_v21 }
  0x22   :  { %229 = vmatprep.subr.mxu1 %v72_v19  ;;  %202 = vmatpush3.msra.mxu0 %v55_v22 }
  0x23   :  { %245 = vmatpush3.msra.mxu1 %v56_v20  ;;  %203 = vmatprep.subr.mxu0 %v70_v23 }
  0x24   :  { %230 = vmatprep.subr.mxu1 %v71_v21  ;;  %204 = vmatpush3.msra.mxu0 %v54_v24 }
  0x25   :  { %246 = vmatpush3.msra.mxu1 %v55_v22  ;;  %205 = vmatprep.subr.mxu0 %v69_v25 }
  0x26   :  { %231 = vmatprep.subr.mxu1 %v70_v23  ;;  %206 = vmatpush3.msra.mxu0 %v53_v26 }
  0x27   :  { %247 = vmatpush3.msra.mxu1 %v54_v24  ;;  %207 = vmatprep.subr.mxu0 %v68_v27 }
  0x28   :  { %232 = vmatprep.subr.mxu1 %v69_v25  ;;  %208 = vmatpush3.msra.mxu0 %v52_v28 }
  0x29   :  { %248 = vmatpush3.msra.mxu1 %v53_v26  ;;  %209 = vmatprep.subr.mxu0 %v67_v29 }
  0x2a   :  { %233 = vmatprep.subr.mxu1 %v68_v27  ;;  %210 = vmatpush3.msra.mxu0 %v51_v30 }
  0x2b   :  { %249 = vmatpush3.msra.mxu1 %v52_v28  ;;  %211 = vmatprep.subr.mxu0 %v66_v31 }
  0x2c   :  { %234 = vmatprep.subr.mxu1 %v67_v29  ;;  %212 = vmatpush3.msra.mxu0 %v50_v32 }
  0x2d   :  { %250 = vmatpush3.msra.mxu1 %v51_v30  ;;  %213 = vmatprep.subr.mxu0 %v65_v33 }
  0x2e   :  { %235 = vmatprep.subr.mxu1 %v66_v31  ;;  %214 = vmatpush3.msra.mxu0 %v49_v34 }
  0x2f   :  { %251 = vmatpush3.msra.mxu1 %v50_v32 }
  0x30   :  { %236 = vmatprep.subr.mxu1 %v65_v33 }
  0x31   :  { %252 = vmatpush3.msra.mxu1 %v49_v34 }
  0x8b   :  { %v33_v38 = vpop.permute.xlu0 %32 }
  0x8c   :  { %vm37_vm0 = vcmp.eq.s32.totalorder %v29_v36, %v33_v38  ;;  %vm38_vm1 = vcmp.eq.s32.totalorder %v30_v37, %v33_v38 }
  0x8d   :  { %179 = vmatprep.mubr.msk.f32.mxu0 %vm38_vm1, %v308_v39 }
  0x8e   :  { %180 = vmatmul.mubr.msk.f32.vlgmr.msra.gmra.mxu0 %vm37_vm0, %v308_v39 }
  0x8f   :  { %v36_v40 = vpop.permute.xlu0 %35 }
  0x90   :  { %vm39_vm2 = vcmp.eq.s32.totalorder %v29_v36, %v36_v40  ;;  %vm40_vm3 = vcmp.eq.s32.totalorder %v30_v37, %v36_v40 }
  0x91   :  { %181 = vmatprep.mubr.msk.f32.mxu1 %vm40_vm3, %v308_v39 }
  0x92   :  { %182 = vmatmul.mubr.msk.f32.vlgmr.msra.gmra.mxu1 %vm39_vm2, %v308_v39 }
 0x14e   :  { %v215_v41 = vpop.f32.mrf.mxu0 }
 0x150   :  { %v216_v42 = vpop.f32.mrf.mxu0 }
 0x151   :  { %v217_v43 = vadd.f32 %v216_v42, %v215_v41 }
 0x152   :  { %v218_v44 = vpop.f32.mrf.mxu1 }
 0x153   :  { %156 = vst [vmem:[#allocation5] sm:$0xff] %v217_v43 }
 0x154   :  { %v219_v45 = vpop.f32.mrf.mxu1 }
 0x155   :  { %v220_v46 = vadd.f32 %v219_v45, %v218_v44 }
 0x157   :  { %157 = vst [vmem:[#allocation5 + $0x8] sm:$0xff] %v220_v46 }
 0x158   :  { %291 = shalt.err (!%p288_p9)
}
 0x159   :  { %169 = dma.vmem_to_hbm [thread:$0]  %s164_s1, 256, %s345_s2, [#allocation4], %s305_s12, %s305_s12, %s306_s13  }
 0x15a   :  { %302 = dma.done.wait [#allocation4], 256  }
 0x15b   :  { %303 = vsyncadd [#allocation4], 4294967040 }
 0x15c   :  { %173 = vsyncpa [#allocation3], 1 }
 0x15d   :  { %174 = vsyncpa [#allocation4], 1 }

</bundles_post_ra>
